<compile_context>
chip_gen: v5e
topology: v5e:2x2
jax: 0.10.0
libtpu: 0.0.40
codegen_flags: <defaults>
</compile_context>

<pallas_src>
import functools

import jax
import jax.numpy as jnp
from jax.experimental import pallas as pl
from jax.experimental.pallas import tpu as pltpu


def _odefunc_selfatt_kernel(L,
                            z_ref, q_ref,
                            wf_ref, bf_ref,
                            w2p_ref, b2_ref,
                            dz_ref, da_ref, dc_ref):
    z = z_ref[...]                                            # (B, L) f32

    # ---- Fused k|v|h matmul: one 128-wide MXU pass. ----
    # Columns [0,L)=k, [L,2L)=v, [2L,2L+H)=pre-activation hidden of the MLP.
    zw = (jnp.dot(z.astype(jnp.bfloat16), wf_ref[...],
                  preferred_element_type=jnp.float32)
          + bf_ref[...])                                      # (B, 2L+H) f32

    # ---- dz = Linear(tanh(Linear(z)))  (t unused) ----
    # w2 is zero-padded over the k/v rows, so one 128-deep matmul on tanh(zw)
    # equals exactly tanh(h) @ w2 + b2.  tanh goes to the EUP (free slot).
    act = jnp.tanh(zw)                                        # (B, 2L+H)
    dz_ref[...] = (jnp.dot(act.astype(jnp.bfloat16), w2p_ref[...],
                           preferred_element_type=jnp.float32)
                   + b2_ref[...])                             # (B, L)

    k = zw[:, :L]                                             # (B, L) f32
    v = zw[:, L:2 * L]                                        # (B, L) f32

    # ---- da = exp(tanh(bmm(query, k^T per-traj))) — 3-D broadcasts only ----
    q3 = q_ref[...]                                           # (B, T, L) f32
    s = jnp.sum(q3 * k[:, None, :], axis=-1)                  # (B, T)
    da = jnp.exp(jnp.tanh(s))                                 # (B, T) lane-dense
    da_ref[...] = da

    # ---- dc = da * weight_v(z).unsqueeze(1).repeat(1, n_tp, 1) ----
    dc_ref[...] = da[:, :, None] * v[:, None, :]              # (B, T, L)


def prepare_weights(params, matmul_dtype=jnp.bfloat16):
    """One-time (per model) weight fusion / zero-padding / bf16 cast."""
    L = params["wk"].shape[0]
    w_fused = jnp.concatenate([params["wk"], params["wv"], params["w1"]], axis=1)  # (L, 2L+H)
    b_fused = jnp.concatenate([params["bk"], params["bv"], params["b1"]], axis=1)  # (1, 2L+H)
    w2p = jnp.concatenate(
        [jnp.zeros((2 * L, L), params["w2"].dtype), params["w2"]], axis=0)         # (2L+H, L)
    return {
        "wq": params["wq"].astype(jnp.float32),
        "bq": params["bq"].astype(jnp.float32),
        "w_fused": w_fused.astype(matmul_dtype),
        "b_fused": b_fused.astype(jnp.float32),
        "w2p": w2p.astype(matmul_dtype),
        "b2": params["b2"].astype(jnp.float32),
    }


def set_query(fused, query_raw):
    """Mirrors module.set_query: query = weight_q(raw_query), once per solve."""
    B, T, D1 = query_raw.shape
    q = jnp.einsum("btd,dl->btl", query_raw, fused["wq"]) + fused["bq"][0]
    return q.astype(jnp.float32)                              # (B, T, L)


def odefunc_selfatt_forward_batched(fused, query, z_all):
    """S batched RHS evals sharing one projected query / weight set.

    z_all: (S, B, L), query: (B, T, L)
    Returns (dz (S,B,L), da (S,B,T,1), dc (S,B,T,L)).
    """
    S, B, L = z_all.shape
    _, T, _ = query.shape
    F = fused["w_fused"].shape[1]                     # 2L + H

    kernel = functools.partial(_odefunc_selfatt_kernel, L)
    const2 = lambda s: (0, 0)                         # resident across grid steps
    const3 = lambda s: (0, 0, 0)

    dz_all, da_all, dc_all = pl.pallas_call(
        kernel,
        out_shape=(
            jax.ShapeDtypeStruct((S, B, L), jnp.float32),
            jax.ShapeDtypeStruct((S, B, T), jnp.float32),
            jax.ShapeDtypeStruct((S, B, T, L), jnp.float32),
        ),
        grid=(S,),
        in_specs=[
            pl.BlockSpec((None, B, L), lambda s: (s, 0, 0)),   # z (per-eval block)
            pl.BlockSpec((B, T, L), const3),                   # projected query (resident)
            pl.BlockSpec((L, F), const2),                      # fused [wk|wv|w1] bf16
            pl.BlockSpec((1, F), const2),                      # fused bias
            pl.BlockSpec((F, L), const2),                      # zero-padded w2   bf16
            pl.BlockSpec((1, L), const2),                      # b2
        ],
        out_specs=(
            pl.BlockSpec((None, B, L), lambda s: (s, 0, 0)),
            pl.BlockSpec((None, B, T), lambda s: (s, 0, 0)),
            pl.BlockSpec((None, B, T, L), lambda s: (s, 0, 0, 0)),
        ),
        compiler_params=pltpu.CompilerParams(
            dimension_semantics=("parallel",)),
    )(z_all, query,
      fused["w_fused"], fused["b_fused"], fused["w2p"], fused["b2"])

    return dz_all, da_all[..., None], dc_all


def odefunc_selfatt_forward(fused, query, z):
    """Single-eval convenience wrapper (matches the module's forward granularity)."""
    dz, da, dc = odefunc_selfatt_forward_batched(fused, query, z[None])
    return dz[0], da[0], dc[0]


def _init_params(key, input_dim, latent_dim, hidden):
    """Deterministic init mimicking utils.init_network_weights (normal*0.1, zero bias)."""
    d1 = input_dim + 1
    ks = jax.random.split(key, 5)
    return {
        "wq": jax.random.normal(ks[0], (d1, latent_dim), jnp.float32) * 0.1,
        "bq": jnp.zeros((1, latent_dim), jnp.float32),
        "wk": jax.random.normal(ks[1], (latent_dim, latent_dim), jnp.float32) * 0.1,
        "bk": jnp.zeros((1, latent_dim), jnp.float32),
        "wv": jax.random.normal(ks[2], (latent_dim, latent_dim), jnp.float32) * 0.1,
        "bv": jnp.zeros((1, latent_dim), jnp.float32),
        "w1": jax.random.normal(ks[3], (latent_dim, hidden), jnp.float32) * 0.1,
        "b1": jnp.zeros((1, hidden), jnp.float32),
        "w2": jax.random.normal(ks[4], (hidden, latent_dim), jnp.float32) * 0.1,
        "b2": jnp.zeros((1, latent_dim), jnp.float32),
    }


def _reference(params, z, query_raw):
    """Pure-JAX f32 reference mirroring the PyTorch forward (one eval)."""
    query = jnp.einsum("btd,dl->btl", query_raw, params["wq"]) + params["bq"][0]
    k = z @ params["wk"] + params["bk"][0]
    v = z @ params["wv"] + params["bv"][0]
    h = jnp.tanh(z @ params["w1"] + params["b1"][0])
    dz = h @ params["w2"] + params["b2"][0]
    da = jnp.exp(jnp.tanh(jnp.einsum("btl,bl->bt", query, k)))[..., None]
    dc = da * v[:, None, :]
    return dz, da, dc


if __name__ == "__main__":
    # n_traj=2, n_tp=8, input_dim=3 (=> input_dim+1=4), latent=32, MLP hidden=64.
    B, T, INPUT_DIM, L, H = 2, 8, 3, 32, 64
    S = 4  # RHS evaluations batched into one pallas_call (weights DMA'd once)

    key = jax.random.PRNGKey(0)
    kp, kz, kq = jax.random.split(key, 3)
    params = _init_params(kp, INPUT_DIM, L, H)
    fused = prepare_weights(params)              # once per model (amortized)

    z_all = jax.random.normal(kz, (S, B, L), jnp.float32)
    query_raw = jax.random.normal(kq, (B, T, INPUT_DIM + 1), jnp.float32)
    query = set_query(fused, query_raw)          # once per ODE solve (= set_query)

    dz, da, dc = odefunc_selfatt_forward_batched(fused, query, z_all)
    jax.block_until_ready((dz, da, dc))

    assert dz.shape == (S, B, L)
    assert da.shape == (S, B, T, 1)
    assert dc.shape == (S, B, T, L)

    # bf16 matmul operands (f32 accumulation) -> loosened tolerances vs the
    # pure-f32 reference.
    for s in range(S):
        dz_r, da_r, dc_r = _reference(params, z_all[s], query_raw)
        assert jnp.allclose(dz[s], dz_r, atol=3e-2, rtol=3e-2)
        assert jnp.allclose(da[s], da_r, atol=3e-2, rtol=3e-2)
        assert jnp.allclose(dc[s], dc_r, atol=3e-2, rtol=3e-2)

    # Single-eval wrapper (module's forward(t, states) granularity) is consistent.
    dz1, da1, dc1 = odefunc_selfatt_forward(fused, query, z_all[0])
    jax.block_until_ready((dz1, da1, dc1))
    assert jnp.allclose(dz1, dz[0], atol=1e-5, rtol=1e-5)
    assert jnp.allclose(da1, da[0], atol=1e-5, rtol=1e-5)
    assert jnp.allclose(dc1, dc[0], atol=1e-5, rtol=1e-5)

    print("KERNEL_OK")
</pallas_src>

<mosaic_0001>
module attributes {stable_mosaic.version = 11 : i64} {
  func.func @_odefunc_selfatt_kernel(%arg0: i32, %arg1: memref<1x2x32xf32, #tpu.memory_space<vmem>>, %arg2: memref<2x8x32xf32, #tpu.memory_space<vmem>>, %arg3: memref<32x128xbf16, #tpu.memory_space<vmem>>, %arg4: memref<1x128xf32, #tpu.memory_space<vmem>>, %arg5: memref<128x32xbf16, #tpu.memory_space<vmem>>, %arg6: memref<1x32xf32, #tpu.memory_space<vmem>>, %arg7: memref<1x2x32xf32, #tpu.memory_space<vmem>>, %arg8: memref<1x2x8xf32, #tpu.memory_space<vmem>>, %arg9: memref<1x2x8x32xf32, #tpu.memory_space<vmem>>) attributes {dimension_semantics = [#tpu.dimension_semantics<parallel>], iteration_bounds = array<i64: 4>, scalar_prefetch = 0 : i64, scratch_operands = 0 : i64, tpu.core_type = #tpu.core_type<tc>, window_params = [{transform_indices = @transform_0, window_bounds = array<i64: 1, 2, 32>}, {pipeline_mode = #tpu.pipeline_mode<synchronous>, transform_indices = @transform_1, window_bounds = array<i64: 2, 8, 32>}, {pipeline_mode = #tpu.pipeline_mode<synchronous>, transform_indices = @transform_2, window_bounds = array<i64: 32, 128>}, {pipeline_mode = #tpu.pipeline_mode<synchronous>, transform_indices = @transform_3, window_bounds = array<i64: 1, 128>}, {pipeline_mode = #tpu.pipeline_mode<synchronous>, transform_indices = @transform_4, window_bounds = array<i64: 128, 32>}, {pipeline_mode = #tpu.pipeline_mode<synchronous>, transform_indices = @transform_5, window_bounds = array<i64: 1, 32>}, {transform_indices = @transform_6, window_bounds = array<i64: 1, 2, 32>}, {transform_indices = @transform_7, window_bounds = array<i64: 1, 2, 8>}, {transform_indices = @transform_8, window_bounds = array<i64: 1, 2, 8, 32>}]} {
    %c0 = arith.constant 0 : index
    %c0_0 = arith.constant 0 : index
    %c0_1 = arith.constant 0 : index
    %0 = vector.load %arg1[%c0, %c0_0, %c0_1] : memref<1x2x32xf32, #tpu.memory_space<vmem>>, vector<1x2x32xf32>
    %1 = vector.shape_cast %0 : vector<1x2x32xf32> to vector<2x32xf32>
    %2 = arith.truncf %1 : vector<2x32xf32> to vector<2x32xbf16>
    %c0_2 = arith.constant 0 : index
    %c0_3 = arith.constant 0 : index
    %3 = vector.load %arg3[%c0_2, %c0_3] : memref<32x128xbf16, #tpu.memory_space<vmem>>, vector<32x128xbf16>
    %cst = arith.constant dense<0.000000e+00> : vector<2x128xf32>
    %4 = tpu.matmul %2, %3, %cst {dimension_numbers = #tpu.dot_dimension_numbers<[1], [0], [0], [1], [0, 0, 1, 1], [], []>} : vector<2x32xbf16>, vector<32x128xbf16>, vector<2x128xf32> -> vector<2x128xf32>
    %c0_4 = arith.constant 0 : index
    %c0_5 = arith.constant 0 : index
    %5 = vector.load %arg4[%c0_4, %c0_5] : memref<1x128xf32, #tpu.memory_space<vmem>>, vector<1x128xf32>
    %6 = vector.broadcast %5 : vector<1x128xf32> to vector<2x128xf32>
    %7 = arith.addf %4, %6 : vector<2x128xf32>
    %8 = math.tanh %7 : vector<2x128xf32>
    %9 = arith.truncf %8 : vector<2x128xf32> to vector<2x128xbf16>
    %c0_6 = arith.constant 0 : index
    %c0_7 = arith.constant 0 : index
    %10 = vector.load %arg5[%c0_6, %c0_7] : memref<128x32xbf16, #tpu.memory_space<vmem>>, vector<128x32xbf16>
    %cst_8 = arith.constant dense<0.000000e+00> : vector<2x32xf32>
    %11 = tpu.matmul %9, %10, %cst_8 {dimension_numbers = #tpu.dot_dimension_numbers<[1], [0], [0], [1], [0, 0, 1, 1], [], []>} : vector<2x128xbf16>, vector<128x32xbf16>, vector<2x32xf32> -> vector<2x32xf32>
    %c0_9 = arith.constant 0 : index
    %c0_10 = arith.constant 0 : index
    %12 = vector.load %arg6[%c0_9, %c0_10] : memref<1x32xf32, #tpu.memory_space<vmem>>, vector<1x32xf32>
    %13 = vector.broadcast %12 : vector<1x32xf32> to vector<2x32xf32>
    %14 = arith.addf %11, %13 : vector<2x32xf32>
    %c0_11 = arith.constant 0 : index
    %c0_12 = arith.constant 0 : index
    %c0_13 = arith.constant 0 : index
    %15 = vector.load %arg7[%c0_11, %c0_12, %c0_13] : memref<1x2x32xf32, #tpu.memory_space<vmem>>, vector<1x2x32xf32>
    %16 = vector.shape_cast %15 : vector<1x2x32xf32> to vector<2x32xf32>
    %17 = vector.shape_cast %14 : vector<2x32xf32> to vector<1x2x32xf32>
    tpu.vector_store %arg7[%c0_11, %c0_12, %c0_13], %17 {strides = array<i32>} : memref<1x2x32xf32, #tpu.memory_space<vmem>>, vector<1x2x32xf32>,
    %18 = vector.extract_strided_slice %7 {offsets = [0, 0], sizes = [2, 32], strides = [1, 1]} : vector<2x128xf32> to vector<2x32xf32>
    %19 = vector.extract_strided_slice %7 {offsets = [0, 32], sizes = [2, 32], strides = [1, 1]} : vector<2x128xf32> to vector<2x32xf32>
    %c0_14 = arith.constant 0 : index
    %c0_15 = arith.constant 0 : index
    %c0_16 = arith.constant 0 : index
    %20 = vector.load %arg2[%c0_14, %c0_15, %c0_16] : memref<2x8x32xf32, #tpu.memory_space<vmem>>, vector<2x8x32xf32>
    %21 = vector.shape_cast %18 : vector<2x32xf32> to vector<2x1x32xf32>
    %22 = vector.broadcast %21 : vector<2x1x32xf32> to vector<2x8x32xf32>
    %23 = arith.mulf %20, %22 : vector<2x8x32xf32>
    %cst_17 = arith.constant dense<0.000000e+00> : vector<2x8xf32>
    %24 = vector.multi_reduction <add>, %23, %cst_17 [2] : vector<2x8x32xf32> to vector<2x8xf32>
    %25 = math.tanh %24 : vector<2x8xf32>
    %26 = math.exp %25 : vector<2x8xf32>
    %c0_18 = arith.constant 0 : index
    %c0_19 = arith.constant 0 : index
    %c0_20 = arith.constant 0 : index
    %27 = vector.load %arg8[%c0_18, %c0_19, %c0_20] : memref<1x2x8xf32, #tpu.memory_space<vmem>>, vector<1x2x8xf32>
    %28 = vector.shape_cast %27 : vector<1x2x8xf32> to vector<2x8xf32>
    %29 = vector.shape_cast %26 : vector<2x8xf32> to vector<1x2x8xf32>
    tpu.vector_store %arg8[%c0_18, %c0_19, %c0_20], %29 {strides = array<i32>} : memref<1x2x8xf32, #tpu.memory_space<vmem>>, vector<1x2x8xf32>,
    %30 = vector.shape_cast %26 : vector<2x8xf32> to vector<2x8x1xf32>
    %31 = vector.shape_cast %19 : vector<2x32xf32> to vector<2x1x32xf32>
    %32 = vector.broadcast %30 : vector<2x8x1xf32> to vector<2x8x32xf32>
    %33 = vector.broadcast %31 : vector<2x1x32xf32> to vector<2x8x32xf32>
    %34 = arith.mulf %32, %33 : vector<2x8x32xf32>
    %c0_21 = arith.constant 0 : index
    %c0_22 = arith.constant 0 : index
    %c0_23 = arith.constant 0 : index
    %c0_24 = arith.constant 0 : index
    %35 = vector.load %arg9[%c0_21, %c0_22, %c0_23, %c0_24] : memref<1x2x8x32xf32, #tpu.memory_space<vmem>>, vector<1x2x8x32xf32>
    %36 = vector.shape_cast %35 : vector<1x2x8x32xf32> to vector<2x8x32xf32>
    %37 = vector.shape_cast %34 : vector<2x8x32xf32> to vector<1x2x8x32xf32>
    tpu.vector_store %arg9[%c0_21, %c0_22, %c0_23, %c0_24], %37 {strides = array<i32>} : memref<1x2x8x32xf32, #tpu.memory_space<vmem>>, vector<1x2x8x32xf32>,
    return
  }
  func.func @transform_0(%arg0: i32) -> (i32, i32, i32) {
    %c0_i32 = arith.constant 0 : i32
    %c0_i32_0 = arith.constant 0 : i32
    %c0_i32_1 = arith.constant 0 : i32
    return %arg0, %c0_i32, %c0_i32_0 : i32, i32, i32
  }
  func.func @transform_1(%arg0: i32) -> (i32, i32, i32) {
    %c0_i32 = arith.constant 0 : i32
    %c0_i32_0 = arith.constant 0 : i32
    %c0_i32_1 = arith.constant 0 : i32
    %c0_i32_2 = arith.constant 0 : i32
    return %c0_i32, %c0_i32_0, %c0_i32_1 : i32, i32, i32
  }
  func.func @transform_2(%arg0: i32) -> (i32, i32) {
    %c0_i32 = arith.constant 0 : i32
    %c0_i32_0 = arith.constant 0 : i32
    %c0_i32_1 = arith.constant 0 : i32
    return %c0_i32, %c0_i32_0 : i32, i32
  }
  func.func @transform_3(%arg0: i32) -> (i32, i32) {
    %c0_i32 = arith.constant 0 : i32
    %c0_i32_0 = arith.constant 0 : i32
    %c0_i32_1 = arith.constant 0 : i32
    return %c0_i32, %c0_i32_0 : i32, i32
  }
  func.func @transform_4(%arg0: i32) -> (i32, i32) {
    %c0_i32 = arith.constant 0 : i32
    %c0_i32_0 = arith.constant 0 : i32
    %c0_i32_1 = arith.constant 0 : i32
    return %c0_i32, %c0_i32_0 : i32, i32
  }
  func.func @transform_5(%arg0: i32) -> (i32, i32) {
    %c0_i32 = arith.constant 0 : i32
    %c0_i32_0 = arith.constant 0 : i32
    %c0_i32_1 = arith.constant 0 : i32
    return %c0_i32, %c0_i32_0 : i32, i32
  }
  func.func @transform_6(%arg0: i32) -> (i32, i32, i32) {
    %c0_i32 = arith.constant 0 : i32
    %c0_i32_0 = arith.constant 0 : i32
    %c0_i32_1 = arith.constant 0 : i32
    return %arg0, %c0_i32, %c0_i32_0 : i32, i32, i32
  }
  func.func @transform_7(%arg0: i32) -> (i32, i32, i32) {
    %c0_i32 = arith.constant 0 : i32
    %c0_i32_0 = arith.constant 0 : i32
    %c0_i32_1 = arith.constant 0 : i32
    return %arg0, %c0_i32, %c0_i32_0 : i32, i32, i32
  }
  func.func @transform_8(%arg0: i32) -> (i32, i32, i32, i32) {
    %c0_i32 = arith.constant 0 : i32
    %c0_i32_0 = arith.constant 0 : i32
    %c0_i32_1 = arith.constant 0 : i32
    %c0_i32_2 = arith.constant 0 : i32
    return %arg0, %c0_i32, %c0_i32_0, %c0_i32_1 : i32, i32, i32, i32
  }
}

</mosaic_0001>

<bundles_post_ra>
// kernel: tpu_custom_call.1
= control target key start
LH: loop header
LB: loop body
LE: loop exit
PB: predicated region body
PF: predicated region fallthrough
CT: control target
= control target key end

     0   :  { %s1158_s0 = inlined_call_operand.vmem [shape: f32[4,2,32], index: 0, kind: input, shape index: {}]   ;;  %s1159_s1 = inlined_call_operand.vmem [shape: f32[2,8,32], index: 1, kind: input, shape index: {}]   ;;  %s1160_s2 = inlined_call_operand.vmem [shape: bf16[32,128], index: 2, kind: input, shape index: {}]   ;;  %s1161_s3 = inlined_call_operand.vmem [shape: f32[1,128], index: 3, kind: input, shape index: {}]   ;;  %s1162_s4 = inlined_call_operand.vmem [shape: bf16[128,32], index: 4, kind: input, shape index: {}]   ;;  %s1163_s5 = inlined_call_operand.vmem [shape: f32[1,32], index: 5, kind: input, shape index: {}]   ;;  %s1164_s6 = inlined_call_operand.hbm [shape: f32[4,2,32], index: 6, kind: output, shape index: {0}]   ;;  %s1165_s7 = inlined_call_operand.hbm [shape: f32[4,2,8], index: 7, kind: output, shape index: {1}]   ;;  %s1166_s8 = inlined_call_operand.hbm [shape: f32[4,2,8,32], index: 8, kind: output, shape index: {2}]  }
   0x1   :  { %1169 = sst [smem:[#allocation9_spill]] %s1158_s0 }
   0x2   :  { %14 = vsyncpa [#allocation3], 0 }
   0x3   :  { %16 = vsyncpa [#allocation3 + $0x1], 0 }
   0x4   :  { %17 = vsyncpa [#allocation5], 0 }
   0x5   :  { %19 = vsyncpa [#allocation5 + $0x1], 0  ;;  %s973_s27 = smov 0   ;;  %s975_s28 = smov 0  }
   0x6   :  { %s977_s29 = smov 0   ;;  %s979_s30 = smov 0  }
   0x7 LB: > { %s994_s9 = sadd.s32 4294967295, %s923_s30   ;;  %s1167_s10 = sadd.s32 4294967294, %s923_s30   ;;  %s923_s30 = sphi %s979_s30, %s1178_s30   ;;  %s919_s29 = sphi %s977_s29, %s1177_s29   ;;  %s915_s28 = sphi %s975_s28, %s1176_s28   ;;  %s911_s27 = sphi %s973_s27, %s1175_s27  }
   0x8   : > { %s998_s11 = sadd.s32 1, %s923_s30   ;;  %s163_s12 = sadd.s32 1, %s919_s29 }
   0x9   : > { %s160_s13 = ssub.s32 %s923_s30, %s998_s11  ;;  %p173_p0 = scmp.ne.s32.totalorder %s919_s29, %s915_s28 }
   0xa   : > { %p161_p1 = scmp.eq.s32.totalorder %s160_s13, 0  ;;  %p174_p2 = scmp.eq.s32.totalorder %s994_s9, 3 }
   0xb   : > { %p179_p3 = scmp.ne.s32.totalorder %s915_s28, %s911_s27  ;;  %p180_p4 = scmp.eq.s32.totalorder %s1167_s10, 3 }
   0xc   : > { %s1011_s14 = scalar_select %p161_p1, %s919_s29, %s163_s12  }
   0xd   : > { %p1013_p5 = por %p174_p2, %p173_p0  ;;  %p1017_p6 = por %p180_p4, %p179_p3 }
   0xe   : > { %p671_p7 = scmp.ge.s32.totalorder %s923_s30, 1  ;;  %p272_p8 = scmp.lt.s32.totalorder %s923_s30, 5 }
  0x10   : > { %p273_p9 = pnand %p671_p7, %p272_p8 }
  0x11   : > { %p315_p10 = scmp.lt.s32.totalorder (!%p273_p9), %s994_s9, 3  ;;  %s1172_s0 = sld [smem:[#allocation9_spill]] (!%p273_p9) }
  0x12   : > { %276 = sbr.rel (%p273_p9) target bundleno = 428 (0x1ac), region = 44  ;;  %s1074_s24 = sand.u32 (!%p273_p9), 1, %s915_s28  }
  0x13   : > { %s1168_s12 = sshll.u32 (!%p273_p9), %s1074_s24, 1  ;;  %s720_s13 = sshll.u32 (!%p273_p9), %s994_s9, 1 }
  0x14   : > { %s510_s19 = scalar_lea.hbm (!%p273_p9), %s1164_s6, %s720_s13  ;;  %s300_s20 = scalar_lea.vmem (!%p273_p9), [#allocation2], %s1168_s12 }
  0x15   : > { %s512_s21 = sshll.u32 (!%p273_p9), %s300_s20, 4  ;;  %s514_s22 = sshll.u32 (!%p273_p9), %s510_s19, 4  ;;  %s513_s21 = int_to_ptr.vmem [resolvable:$true] %s512_s21  ;;  %s515_s22 = int_to_ptr.hbm [resolvable:$true] %s514_s22 }
  0x16   : > { %s815_s25 = sshra.s32 (!%p273_p9), %s515_s22, 4  ;;  %s821_s10 = scalar_lea.hbm (!%p273_p9), %s1164_s6, 8  ;;  %s816_s25 = int_to_ptr.hbm [resolvable:$true] %s815_s25 }
  0x17   : > { %v727_v0 = vld [vmem:[%s1160_s2 + $0x8] sm:$0xff]  ;;  %v735_v1 = vld [vmem:[%s1162_s4 + $0x38] sm:$0xff]  ;;  %v726_v2 = vld [vmem:[%s1160_s2] sm:$0xff]  ;;  %s316_s23 = scalar_select %p315_p10, %s994_s9, 3  ;;  %vm342_vm0 = vcmask 261120   ;;  %vm442_vm1 = vcmask 254976   ;;  %v468_v37 = vlaneseq }
  0x18   : > { %352 = vmatpush.bf16.msra.mxu0 %v727_v0  ;;  %429 = vmatpush.bf16.msra.mxu1 %v735_v1  ;;  %v734_v3 = vld [vmem:[%s1162_s4 + $0x30] sm:$0xff]  ;;  %v733_v5 = vld [vmem:[%s1162_s4 + $0x28] sm:$0xff]  ;;  %v732_v7 = vld [vmem:[%s1162_s4 + $0x20] sm:$0xff]  ;;  %p822_p0 = scmp.lt.s32.totalorder %s816_s25, %s1164_s6 }
  0x19   : > { %s675_s26 = sshll.u32 %s316_s23, 1  ;;  %v731_v8 = vld [vmem:[%s1162_s4 + $0x18] sm:$0xff]  ;;  %v730_v9 = vld [vmem:[%s1162_s4 + $0x10] sm:$0xff]  ;;  %v729_v10 = vld [vmem:[%s1162_s4 + $0x8] sm:$0xff]  ;;  %s490_s23 = scalar_lea.sflag [#allocation3], %s1074_s24 }
  0x1a   : > { %s318_s17 = scalar_lea.vmem %s1172_s0, %s675_s26  ;;  %v728_v11 = vld [vmem:[%s1162_s4] sm:$0xff]  ;;  %v445_v22 = vld [vmem:[%s1159_s1 + $0x8] sm:$0xff]  ;;  %s817_s26 = scalar_lea.hbm %s816_s25, 2 }
  0x1b   : > { %v320_v4 = vld [vmem:[%s318_s17] sm:$0x3]  ;;  %p818_p11 = scmp.ne.s32.totalorder %s816_s25, %s817_s26  ;;  %p823_p1 = scmp.lt.s32.totalorder %s821_s10, %s817_s26 }
  0x1c   : > { %353 = vmatpush.bf16.msra.mxu0 %v726_v2  ;;  %430 = vmatpush.bf16.msra.mxu1 %v734_v3  ;;  %v321_v6 = vpack.c.bf16 %v320_v4, %v320_v4  ;;  %v789_v12 = vld [vmem:[%s1161_s3] ss:$0 sm:$0xff] }
  0x1d   : > { %v444_v15 = vld [vmem:[%s1159_s1] sm:$0xff]  ;;  %p819_p12 = pnand %p818_p11, %p1013_p5  ;;  %p824_p2 = por %p823_p1, %p822_p0 }
  0x1e   : > { %v790_v31 = vld [vmem:[%s1163_s5] ss:$0 sm:$0xff] }
  0x1f   : > { %684 = vmatmul.msk.bf16.vlgmr.msra.gmra.mxu0 %vm342_vm0, %v321_v6  ;;  %p820_p13 = pneg %p819_p12 }
  0x20   : > { %431 = vmatpush.bf16.msra.mxu1 %v733_v5 }
  0x21   : > { %p825_p3 = pnand %p824_p2, %p820_p13 }
  0x24   : > { %432 = vmatpush.bf16.msra.mxu1 %v732_v7 }
  0x28   : > { %433 = vmatpush.bf16.msra.mxu1 %v731_v8 }
  0x2c   : > { %434 = vmatpush.bf16.msra.mxu1 %v730_v9 }
  0x30   : > { %435 = vmatpush.bf16.msra.mxu1 %v729_v10 }
  0x34   : > { %436 = vmatpush.bf16.msra.mxu1 %v728_v11 }
  0x9c   : > { %v355_v13 = vpop.f32.mrf.mxu0 }
  0x9d   : > { %v356_v14 = vadd.f32 %v789_v12, %v355_v13 }
  0x9f   : > { %v448_v16 = vperm.slane %v356_v14, 0  ;;  %791 = vtanh.f32 %v356_v14  ;;  %v447_v17 = vrot.slane %v356_v14, 1 }
  0xa1   : > { %v452_v18 = vmul.f32 %v448_v16, %v444_v15  ;;  %v1066_v20 = vperm.slane %v447_v17, 0 }
  0xa3   : > { %v454_v19 = vsel %vm342_vm0, %v452_v18, 0.0  ;;  %v453_v25 = vmul.f32 %v1066_v20, %v445_v22 }
  0xa4   : > { %v357_v21 = vpop.f32.mrf.mxu0  ;;  %455 = vadd.xlane.f32.xlu0 %v454_v19 }
  0xa5   : > { %v792_v23 = vpop.eup %791  ;;  %v457_v26 = vsel %vm342_vm0, %v453_v25, 0.0 }
  0xa6   : > { %v360_v24 = vpack.c.bf16 %v792_v23, %v792_v23 }
  0xa8   : > { %437 = vmatmul.bf16.vlgmr.msra.gmra.mxu1 %v360_v24 }
  0xac   : > { %458 = vadd.xlane.f32.xlu0 %v457_v26 }
 0x117   : > { %v456_v27 = vpop.xlane.xlu0 %455 }
 0x118   : > { %793 = vtanh.f32 %v456_v27 }
 0x11e   : > { %v794_v28 = vpop.eup %793 }
 0x11f   : > { %v462_v29 = vmul.f32 1.442695, %v794_v28  ;;  %v459_v30 = vpop.xlane.xlu0 %458 }
 0x120   : > { %795 = vtanh.f32 %v459_v30 }
 0x121   : > { %797 = vpow2.f32 %v462_v29 }
 0x125   : > { %v438_v32 = vpop.f32.mrf.mxu1 }
 0x126   : > { %v796_v33 = vpop.eup %795  ;;  %v439_v34 = vadd.f32 %v790_v31, %v438_v32 }
 0x127   : > { %v798_v35 = vpop.eup %797  ;;  %v464_v36 = vmul.f32 1.442695, %v796_v33 }
 0x128   : > { %v477_v38 = vmul.f32 %v798_v35, %v448_v16  ;;  %443 = vst.msk [vmem:[%s300_s20] sm:$0x3] %vm442_vm1, %v439_v34 }
 0x129   : > { %799 = vpow2.f32 %v464_v36 }
 0x12a   : > { %828 = shalt.err (!%p825_p3)
}
 0x12b   : > { %737 = dma.vmem_to_hbm [thread:$0]  (%p1013_p5), %s513_s21, 32, %s515_s22, %s490_s23   ;;  %v469_v39 = vand.u32 127, %v468_v37  ;;  %vm472_vm2 = vcmask 1041409   ;;  %vm475_vm3 = vcmask 58368  }
 0x12c   : > { %s925_s20 = smov 96   ;;  %s524_s18 = scalar_lea.hbm %s1165_s7, %s720_s13 }
 0x12d   : > { %481 = vrot.lane.b32.xlu1 %v477_v38, %s925_s20  ;;  %v440_v40 = vpop.f32.mrf.mxu1  ;;  %s494_s12 = sand.u32 1, %s994_s9   ;;  %s1173_s10 = sshll.u32 %s1074_s24, 1  ;;  %v470_v42 = vperm.slane %v798_v35, %v469_v39 }
 0x12e   : > { %s307_s25 = scalar_lea.vmem [#allocation4], %s1173_s10  ;;  %s528_s19 = sshll.u32 %s524_s18, 4  ;;  %s529_s19 = int_to_ptr.hbm [resolvable:$true] %s528_s19 }
 0x12f   : > { %s526_s26 = sshll.u32 %s307_s25, 4  ;;  %v800_v41 = vpop.eup %799  ;;  %s1108_s0 = scalar_lea.sflag [#allocation5], %s494_s12  ;;  %s527_s26 = int_to_ptr.vmem [resolvable:$true] %s526_s26 }
 0x130   : > { %v471_v43 = vperm.slane %v800_v41, %v469_v39  ;;  %v478_v44 = vmul.f32 %v800_v41, %v1066_v20  ;;  %s843_s13 = sshra.s32 %s529_s19, 4  ;;  %s849_s17 = scalar_lea.hbm %s1165_s7, 8  ;;  %s844_s13 = int_to_ptr.hbm [resolvable:$true] %s843_s13 }
 0x131   : > { %s845_s21 = scalar_lea.hbm %s844_s13, 2  ;;  %p850_p9 = scmp.lt.s32.totalorder %s844_s13, %s1165_s7 }
 0x132   : > { %v473_v45 = vsel %vm472_vm2, %v471_v43, %v470_v42  ;;  %p846_p4 = scmp.ne.s32.totalorder %s844_s13, %s845_s21  ;;  %p851_p10 = scmp.lt.s32.totalorder %s849_s17, %s845_s21 }
 0x133   : > { %476 = vst.msk [vmem:[%s307_s25] sm:$0x3] %vm475_vm3, %v473_v45 }
 0x134   : > { %p847_p7 = pnand %p846_p4, %p1013_p5  ;;  %p852_p11 = por %p851_p10, %p850_p9 }
 0x135   : > { %483 = vrot.lane.b32.xlu1 %v478_v44, %s925_s20 }
 0x136   : > { %p848_p8 = pneg %p847_p7 }
 0x138   : > { %p853_p12 = pnand %p852_p11, %p848_p8 }
 0x13a   : > { %856 = shalt.err (!%p853_p12)
}
 0x13b   : > { %738 = dma.vmem_to_hbm [thread:$0]  (%p1013_p5), %s527_s26, 32, %s529_s19, %s1108_s0  }
 0x13c   : > { %s674_s20 = sshll.u32 %s1074_s24, 4  ;;  %s736_s12 = sshll.u32 %s994_s9, 4 }
 0x13d   : > { %s314_s25 = scalar_lea.vmem [#allocation6], %s674_s20  ;;  %s539_s13 = scalar_lea.hbm %s1166_s8, %s736_s12 }
 0x13e   : > { %s540_s21 = sshll.u32 %s314_s25, 4  ;;  %s542_s17 = sshll.u32 %s539_s13, 4  ;;  %s541_s21 = int_to_ptr.vmem [resolvable:$true] %s540_s21  ;;  %s543_s17 = int_to_ptr.hbm [resolvable:$true] %s542_s17 }
 0x13f   : > { %s871_s18 = sshra.s32 %s543_s17, 4  ;;  %s877_s19 = scalar_lea.hbm %s1166_s8, 64  ;;  %s872_s18 = int_to_ptr.hbm [resolvable:$true] %s871_s18 }
 0x140   : > { %s873_s24 = scalar_lea.hbm %s872_s18, 16  ;;  %p878_p2 = scmp.lt.s32.totalorder %s872_s18, %s1166_s8 }
 0x141   : > { %p874_p13 = scmp.ne.s32.totalorder %s872_s18, %s873_s24  ;;  %p879_p3 = scmp.lt.s32.totalorder %s877_s19, %s873_s24 }
 0x143   : > { %p875_p0 = pnand %p874_p13, %p1013_p5  ;;  %p880_p4 = por %p879_p3, %p878_p2 }
 0x145   : > { %p876_p1 = pneg %p875_p0 }
 0x147   : > { %p881_p7 = pnand %p880_p4, %p876_p1 }
 0x19f   : > { %v482_v46 = vpop.permute.xlu1 %481 }
 0x1a0   : > { %487 = vst.msk [vmem:[%s314_s25] sm:$0xff] %vm342_vm0, %v482_v46 }
 0x1a7   : > { %v484_v47 = vpop.permute.xlu1 %483 }
 0x1a8   : > { %488 = vst.msk [vmem:[%s314_s25 + $0x8] sm:$0xff] %vm342_vm0, %v484_v47 }
 0x1a9   : > { %884 = shalt.err (!%p881_p7)
}
 0x1aa   : > { %s926_s12 = smov 128   ;;  %s927_s25 = smov 8  }
 0x1ab   : > { %739 = dma.vmem_to_hbm [thread:$0]  (%p1013_p5), %s541_s21, 256, %s543_s17, %s1108_s0, %s926_s12, %s926_s12, %s927_s25  }
 0x1ac PF: > { %p753_p8 = scmp.ge.s32.totalorder %s923_s30, 2  ;;  %s557_s22 = sand.u32 1, %s911_s27  }
 0x1ad   : > { %s558_s23 = scalar_lea.sflag [#allocation3], %s557_s22 }
 0x1ae   : > { %p744_p9 = pnand %p753_p8, %p1017_p6 }
 0x1b0   : > { %p745_p10 = pneg %p744_p9 }
 0x1b2   : > { %902 = dma.done.wait (%p745_p10), %s558_s23, 32  }
 0x1b3   : > { %904 = vsyncadd (%p745_p10), %s558_s23, 4294967264  ;;  %s1174_s13 = sadd.s32 4294967294, %s923_s30  }
 0x1b4   : > { %s567_s18 = sand.u32 1, %s1174_s13  }
 0x1b5   : > { %s568_s24 = scalar_lea.sflag [#allocation5], %s567_s18 }
 0x1b6   : > { %906 = dma.done.wait (%p745_p10), %s568_s24, 288  }
 0x1b7   : > { %908 = vsyncadd (%p745_p10), %s568_s24, 4294967008  ;;  %p22_p5 = scmp.ge.s32.totalorder %s998_s11, 6   ;;  %s1175_s27 = smov %s915_s28 }
 0x1b8   : > { %s1176_s28 = smov %s919_s29  ;;  %s1177_s29 = smov %s1011_s14 }
 0x1b9   : > { %s1178_s30 = smov %s998_s11  ;;  %24 = sbr.rel (!%p22_p5) target bundleno = 7 (0x7), region = 111 }
 0x1be   :  { %584 = vsyncpa [#allocation3], 1 }
 0x1bf   :  { %586 = vsyncpa [#allocation3 + $0x1], 1 }
 0x1c0   :  { %587 = vsyncpa [#allocation5], 1 }
 0x1c1   :  { %589 = vsyncpa [#allocation5 + $0x1], 1 }

</bundles_post_ra>
